<compile_context>
chip_gen: v5e
topology: v5e:2x2
jax: 0.10.0
libtpu: 0.0.40
codegen_flags: <defaults>
</compile_context>

<pallas_src>
import functools

import jax
import jax.numpy as jnp
from jax import lax
from jax.experimental import pallas as pl
from jax.experimental.pallas import tpu as pltpu

DIL = 4      # dilation_val
EPS = 1e-5   # BatchNorm eps
SUB = 8      # f32 sublane tile


def _round_up(x, m):
    return (x + m - 1) // m * m


def _default_num_groups(N):
    """Grid steps: 1 on single-TC chips (v5e/v6e), up to 2 on dual-TC v7x."""
    kind = ""
    try:
        kind = (jax.devices()[0].device_kind or "").lower()
    except Exception:
        pass
    cores = 2 if "v7" in kind else 1
    g = 1
    for d in range(1, min(N, cores) + 1):
        if N % d == 0:
            g = d
    return g


def _boundary_masks(H, W, Lg):
    """(9, Lg) f32 0/1 masks for the 9 dilated-conv taps; periodic in H*W so
    they are shared by every batch element / grid step."""
    L = H * W
    pos = jnp.arange(Lg, dtype=jnp.int32) % L
    yy, xx = pos // W, pos % W
    rows = []
    for ky in range(3):
        for kx in range(3):
            dy, dx = (ky - 1) * DIL, (kx - 1) * DIL
            valid = ((yy + dy >= 0) & (yy + dy < H) &
                     (xx + dx >= 0) & (xx + dx < W))
            rows.append(valid.astype(jnp.float32))
    return jnp.stack(rows, axis=0)


# ----------------------------------------------------------------------------
# Pallas kernel: one batch-group per grid step; activations live as
# (Crp, Lg) f32 tiles (channels on sublanes, flattened batch*space on lanes).
# ----------------------------------------------------------------------------
def spatial_gate_kernel(x_ref, w1_ref, wd1_ref, wd2_ref, mask_ref, p_ref,
                        o_ref, *, W):
    Lg = x_ref.shape[1]                       # (N/G) * H * W, multiple of 128
    x = x_ref[...].astype(jnp.float32)        # (C, Lg)

    # Packed per-channel operands (BN shifts, final-conv weight column, bias).
    t1 = p_ref[:, 0:1]
    t2 = p_ref[:, 1:2]
    t3 = p_ref[:, 2:3]
    wf = p_ref[:, 3:4]
    bf = p_ref[0:1, 4:5]

    # --- 1x1 reduce conv (+ folded BN scale in weights) + shift + ReLU ------
    h = jnp.dot(w1_ref[...], x, preferred_element_type=jnp.float32)   # (Crp, Lg)
    h = jnp.maximum(h + t1, 0.0)

    # --- 3x3 dilated conv (dilation=4, padding=4) as ONE fused matmul -------
    # Contraction over (9 taps x Crp channels); taps built with XLU lane rolls
    # + host-precomputed boundary masks (equivalent to the conv zero padding,
    # and also zeroing any roll across image/batch boundaries).
    def dilated_block(h, wt_ref, t):
        taps = []
        for ky in range(3):
            for kx in range(3):
                off = (ky - 1) * DIL * W + (kx - 1) * DIL
                idx = ky * 3 + kx
                if off == 0:
                    taps.append(h)                       # center tap: no mask
                else:
                    shifted = pltpu.roll(h, shift=(-off) % Lg, axis=1)
                    taps.append(shifted * mask_ref[idx:idx + 1, :])
        stacked = jnp.concatenate(taps, axis=0)          # (9*Crp, Lg)
        out = jnp.dot(wt_ref[...], stacked, preferred_element_type=jnp.float32)
        return jnp.maximum(out + t, 0.0)                 # (Crp, Lg)

    h = dilated_block(h, wd1_ref, t2)
    h = dilated_block(h, wd2_ref, t3)

    # --- final 1x1 conv to one gate channel: sublane reduce, not an M=1 matmul
    g = jnp.sum(h * wf, axis=0, keepdims=True) + bf      # (1, Lg)
    o_ref[...] = g.astype(o_ref.dtype)


# ----------------------------------------------------------------------------
# Wrapper
# ----------------------------------------------------------------------------
def spatial_gate_pallas(x_nchw, p, num_groups=None):
    N, C, H, W = x_nchw.shape
    L = H * W
    G = num_groups if num_groups is not None else _default_num_groups(N)
    assert N % G == 0
    Lg = (N // G) * L
    Crp = p["w1t"].shape[0]

    # Fold batch into the lane axis: (N, C, H, W) -> (C, N*H*W).
    # Small host-side XLA transpose; every in-kernel tensor is then lane-dense.
    x_cl = jnp.transpose(x_nchw, (1, 0, 2, 3)).reshape(C, N * L)

    masks = _boundary_masks(H, W, Lg)                    # (9, Lg)

    def full(shape):
        nd = len(shape)
        return pl.BlockSpec(shape, lambda g, _nd=nd: (0,) * _nd)

    grid_spec = pltpu.PrefetchScalarGridSpec(
        num_scalar_prefetch=0,
        grid=(G,),
        in_specs=[
            pl.BlockSpec((C, Lg), lambda g: (0, g)),   # x (batch folded in lanes)
            full((Crp, C)),          # w1t   (1x1 reduce conv, BN scale folded)
            full((Crp, 9 * Crp)),    # wd1s  (dilated conv 0, taps on K, scaled)
            full((Crp, 9 * Crp)),    # wd2s  (dilated conv 1, scaled)
            full((9, Lg)),           # boundary masks
            full((Crp, 8)),          # packed: t1 | t2 | t3 | wf | bf
        ],
        out_specs=pl.BlockSpec((1, Lg), lambda g: (0, g)),
    )
    gate = pl.pallas_call(
        functools.partial(spatial_gate_kernel, W=W),
        out_shape=jax.ShapeDtypeStruct((1, N * L), x_nchw.dtype),
        grid_spec=grid_spec,
        # NOTE: for much larger H*W, add a spatial grid axis with a 2*DIL halo
        # per dilated conv; size the tile against 64 MiB VMEM on v7x (vs
        # 128 MiB on v5e/v6e) and set vmem_limit_bytes.  At this size the
        # per-step block (<0.5 MiB) is far below any VMEM limit.
        compiler_params=pltpu.CompilerParams(dimension_semantics=("parallel",)),
    )(x_cl, p["w1t"], p["wd1s"], p["wd2s"], masks, p["packed"])

    # (1, N*H*W) -> (N, 1, H, W): moving the size-1 axis is a pure reshape.
    gate = gate.reshape(N, 1, H, W)
    # expand_as(in_tensor): free broadcast, fused by XLA in the consumer.
    return jnp.broadcast_to(gate, (N, C, H, W))


# ----------------------------------------------------------------------------
# Deterministic parameter init (shapes from SpatialGate.__init__) + folding
# ----------------------------------------------------------------------------
def init_params(key, C, reduction_ratio=16):
    Cr = C // reduction_ratio
    ks = jax.random.split(key, 20)

    def rnd(k, shape, scale=0.1):
        return scale * jax.random.normal(k, shape, jnp.float32)

    def bn_params(k0, k1, k2, k3):
        return dict(gamma=1.0 + rnd(k0, (Cr,)), beta=rnd(k1, (Cr,)),
                    mean=rnd(k2, (Cr,)), var=1.0 + jnp.abs(rnd(k3, (Cr,))))

    return dict(
        w1=rnd(ks[0], (1, 1, C, Cr)), b1=rnd(ks[1], (Cr,)),           # HWIO
        bn1=bn_params(ks[2], ks[3], ks[4], ks[5]),
        wd1=rnd(ks[6], (3, 3, Cr, Cr)), bd1=rnd(ks[7], (Cr,)),
        bn2=bn_params(ks[8], ks[9], ks[10], ks[11]),
        wd2=rnd(ks[12], (3, 3, Cr, Cr)), bd2=rnd(ks[13], (Cr,)),
        bn3=bn_params(ks[14], ks[15], ks[16], ks[17]),
        wf=rnd(ks[18], (1, 1, Cr, 1)), bf=rnd(ks[19], (1,)),
    )


def fold_params(raw):
    """Fold BN into the weights (scale) + a per-channel shift, transpose into
    the (channels-on-sublanes, space-on-lanes) kernel layout, zero-pad the
    reduced channel dim Cr up to a multiple of 8, and pack all tiny
    per-channel operands into one (Crp, 8) array."""
    C, Cr = raw["w1"].shape[2], raw["w1"].shape[3]
    Crp = _round_up(Cr, SUB)

    def scale_shift(bn, b):
        s = bn["gamma"] / jnp.sqrt(bn["var"] + EPS)
        t = (b - bn["mean"]) * s + bn["beta"]
        return s, t

    s1, t1 = scale_shift(raw["bn1"], raw["b1"])
    s2, t2 = scale_shift(raw["bn2"], raw["bd1"])
    s3, t3 = scale_shift(raw["bn3"], raw["bd2"])

    # 1x1 reduce conv: (Cr_out, C_in), BN scale folded into the output rows.
    w1t = raw["w1"].reshape(C, Cr).T * s1[:, None]
    w1t = jnp.zeros((Crp, C), jnp.float32).at[:Cr, :].set(w1t)

    def pad_dilated(wd, s):                    # HWIO (3, 3, Cr_in, Cr_out)
        wdp = jnp.zeros((3, 3, Crp, Crp), jnp.float32).at[:, :, :Cr, :Cr].set(wd)
        wts = wdp.reshape(9 * Crp, Crp).T      # (Crp_out, 9*Crp_in), tap-major
        sp = jnp.zeros((Crp,), jnp.float32).at[:Cr].set(s)
        return wts * sp[:, None]               # fold BN scale into output rows

    packed = jnp.zeros((Crp, 8), jnp.float32)
    packed = packed.at[:Cr, 0].set(t1)
    packed = packed.at[:Cr, 1].set(t2)
    packed = packed.at[:Cr, 2].set(t3)
    packed = packed.at[:Cr, 3].set(raw["wf"].reshape(Cr))   # final 1x1 weight
    packed = packed.at[0, 4].set(raw["bf"][0])               # final conv bias

    return dict(
        w1t=w1t,
        wd1s=pad_dilated(raw["wd1"], s2),
        wd2s=pad_dilated(raw["wd2"], s3),
        packed=packed,
    )


# ----------------------------------------------------------------------------
# Pure-JAX reference (for correctness check)
# ----------------------------------------------------------------------------
def spatial_gate_reference(x_nchw, raw):
    x = jnp.transpose(x_nchw, (0, 2, 3, 1))  # NHWC

    def conv(x, w, b, dilation=1, padding=0):
        y = lax.conv_general_dilated(
            x, w, window_strides=(1, 1),
            padding=((padding, padding), (padding, padding)),
            rhs_dilation=(dilation, dilation),
            dimension_numbers=("NHWC", "HWIO", "NHWC"),
            precision=lax.Precision.HIGHEST)
        return y + b

    def bn(x, p):
        return p["gamma"] * (x - p["mean"]) / jnp.sqrt(p["var"] + EPS) + p["beta"]

    h = jax.nn.relu(bn(conv(x, raw["w1"], raw["b1"]), raw["bn1"]))
    h = jax.nn.relu(bn(conv(h, raw["wd1"], raw["bd1"], DIL, DIL), raw["bn2"]))
    h = jax.nn.relu(bn(conv(h, raw["wd2"], raw["bd2"], DIL, DIL), raw["bn3"]))
    g = conv(h, raw["wf"], raw["bf"])            # (N, H, W, 1)
    out = jnp.broadcast_to(g, x.shape)           # expand_as(in_tensor)
    return jnp.transpose(out, (0, 3, 1, 2))      # back to NCHW


if __name__ == "__main__":
    # gate_channel=64, reduction_ratio=16 -> reduced channels Cr=4 (padded to 8)
    N, C, H, W = 2, 64, 16, 16
    key = jax.random.PRNGKey(0)
    kx, kp = jax.random.split(key)
    x_nchw = jax.random.normal(kx, (N, C, H, W), jnp.float32)

    raw = init_params(kp, C, reduction_ratio=16)
    folded = fold_params(raw)

    out_nchw = spatial_gate_pallas(x_nchw, folded)
    jax.block_until_ready(out_nchw)

    ref = spatial_gate_reference(x_nchw, raw)
    assert out_nchw.shape == (N, C, H, W)
    if not jnp.allclose(out_nchw, ref, rtol=1e-3, atol=1e-3):
        raise AssertionError(
            f"mismatch: max abs err {float(jnp.max(jnp.abs(out_nchw - ref)))}")
    print("KERNEL_OK")
</pallas_src>

<mosaic_0001>
module attributes {stable_mosaic.version = 11 : i64} {
  func.func @spatial_gate_kernel(%arg0: i32, %arg1: memref<64x512xf32, #tpu.memory_space<vmem>>, %arg2: memref<8x64xf32, #tpu.memory_space<vmem>>, %arg3: memref<8x72xf32, #tpu.memory_space<vmem>>, %arg4: memref<8x72xf32, #tpu.memory_space<vmem>>, %arg5: memref<9x512xf32, #tpu.memory_space<vmem>>, %arg6: memref<8x8xf32, #tpu.memory_space<vmem>>, %arg7: memref<1x512xf32, #tpu.memory_space<vmem>>) attributes {dimension_semantics = [#tpu.dimension_semantics<parallel>], iteration_bounds = array<i64: 1>, scalar_prefetch = 0 : i64, scratch_operands = 0 : i64, tpu.core_type = #tpu.core_type<tc>, window_params = [{transform_indices = @transform_0, window_bounds = array<i64: 64, 512>}, {pipeline_mode = #tpu.pipeline_mode<synchronous>, transform_indices = @transform_1, window_bounds = array<i64: 8, 64>}, {pipeline_mode = #tpu.pipeline_mode<synchronous>, transform_indices = @transform_2, window_bounds = array<i64: 8, 72>}, {pipeline_mode = #tpu.pipeline_mode<synchronous>, transform_indices = @transform_3, window_bounds = array<i64: 8, 72>}, {pipeline_mode = #tpu.pipeline_mode<synchronous>, transform_indices = @transform_4, window_bounds = array<i64: 9, 512>}, {pipeline_mode = #tpu.pipeline_mode<synchronous>, transform_indices = @transform_5, window_bounds = array<i64: 8, 8>}, {transform_indices = @transform_6, window_bounds = array<i64: 1, 512>}]} {
    %c0 = arith.constant 0 : index
    %c0_0 = arith.constant 0 : index
    %0 = vector.load %arg1[%c0, %c0_0] : memref<64x512xf32, #tpu.memory_space<vmem>>, vector<64x512xf32>
    %c0_1 = arith.constant 0 : index
    %c0_2 = arith.constant 0 : index
    %1 = vector.load %arg6[%c0_1, %c0_2] : memref<8x8xf32, #tpu.memory_space<vmem>>, vector<8x1xf32>
    %c0_3 = arith.constant 0 : index
    %c1 = arith.constant 1 : index
    %2 = vector.load %arg6[%c0_3, %c1] : memref<8x8xf32, #tpu.memory_space<vmem>>, vector<8x1xf32>
    %c0_4 = arith.constant 0 : index
    %c2 = arith.constant 2 : index
    %3 = vector.load %arg6[%c0_4, %c2] : memref<8x8xf32, #tpu.memory_space<vmem>>, vector<8x1xf32>
    %c0_5 = arith.constant 0 : index
    %c3 = arith.constant 3 : index
    %4 = vector.load %arg6[%c0_5, %c3] : memref<8x8xf32, #tpu.memory_space<vmem>>, vector<8x1xf32>
    %c0_6 = arith.constant 0 : index
    %c4 = arith.constant 4 : index
    %5 = vector.load %arg6[%c0_6, %c4] : memref<8x8xf32, #tpu.memory_space<vmem>>, vector<1x1xf32>
    %c0_7 = arith.constant 0 : index
    %c0_8 = arith.constant 0 : index
    %6 = vector.load %arg2[%c0_7, %c0_8] : memref<8x64xf32, #tpu.memory_space<vmem>>, vector<8x64xf32>
    %cst = arith.constant dense<0.000000e+00> : vector<8x512xf32>
    %7 = tpu.matmul %6, %0, %cst {dimension_numbers = #tpu.dot_dimension_numbers<[1], [0], [0], [1], [0, 0, 1, 1], [], []>} : vector<8x64xf32>, vector<64x512xf32>, vector<8x512xf32> -> vector<8x512xf32>
    %8 = vector.broadcast %1 : vector<8x1xf32> to vector<8x512xf32>
    %9 = arith.addf %7, %8 : vector<8x512xf32>
    %cst_9 = arith.constant 0.000000e+00 : f32
    %10 = vector.broadcast %cst_9 : f32 to vector<8x512xf32>
    %11 = arith.maximumf %9, %10 : vector<8x512xf32>
    %c68_i32 = arith.constant 68 : i32
    %12 = tpu.dynamic_rotate %11 by %c68_i32 dim 1 : vector<8x512xf32>, i32 -> vector<8x512xf32>
    %c0_10 = arith.constant 0 : index
    %c0_11 = arith.constant 0 : index
    %13 = vector.load %arg5[%c0_10, %c0_11] : memref<9x512xf32, #tpu.memory_space<vmem>>, vector<1x512xf32>
    %14 = vector.broadcast %13 : vector<1x512xf32> to vector<8x512xf32>
    %15 = arith.mulf %12, %14 : vector<8x512xf32>
    %c64_i32 = arith.constant 64 : i32
    %16 = tpu.dynamic_rotate %11 by %c64_i32 dim 1 : vector<8x512xf32>, i32 -> vector<8x512xf32>
    %c1_12 = arith.constant 1 : index
    %c0_13 = arith.constant 0 : index
    %17 = vector.load %arg5[%c1_12, %c0_13] : memref<9x512xf32, #tpu.memory_space<vmem>>, vector<1x512xf32>
    %18 = vector.broadcast %17 : vector<1x512xf32> to vector<8x512xf32>
    %19 = arith.mulf %16, %18 : vector<8x512xf32>
    %c60_i32 = arith.constant 60 : i32
    %20 = tpu.dynamic_rotate %11 by %c60_i32 dim 1 : vector<8x512xf32>, i32 -> vector<8x512xf32>
    %c2_14 = arith.constant 2 : index
    %c0_15 = arith.constant 0 : index
    %21 = vector.load %arg5[%c2_14, %c0_15] : memref<9x512xf32, #tpu.memory_space<vmem>>, vector<1x512xf32>
    %22 = vector.broadcast %21 : vector<1x512xf32> to vector<8x512xf32>
    %23 = arith.mulf %20, %22 : vector<8x512xf32>
    %c4_i32 = arith.constant 4 : i32
    %24 = tpu.dynamic_rotate %11 by %c4_i32 dim 1 : vector<8x512xf32>, i32 -> vector<8x512xf32>
    %c3_16 = arith.constant 3 : index
    %c0_17 = arith.constant 0 : index
    %25 = vector.load %arg5[%c3_16, %c0_17] : memref<9x512xf32, #tpu.memory_space<vmem>>, vector<1x512xf32>
    %26 = vector.broadcast %25 : vector<1x512xf32> to vector<8x512xf32>
    %27 = arith.mulf %24, %26 : vector<8x512xf32>
    %c508_i32 = arith.constant 508 : i32
    %28 = tpu.dynamic_rotate %11 by %c508_i32 dim 1 : vector<8x512xf32>, i32 -> vector<8x512xf32>
    %c5 = arith.constant 5 : index
    %c0_18 = arith.constant 0 : index
    %29 = vector.load %arg5[%c5, %c0_18] : memref<9x512xf32, #tpu.memory_space<vmem>>, vector<1x512xf32>
    %30 = vector.broadcast %29 : vector<1x512xf32> to vector<8x512xf32>
    %31 = arith.mulf %28, %30 : vector<8x512xf32>
    %c452_i32 = arith.constant 452 : i32
    %32 = tpu.dynamic_rotate %11 by %c452_i32 dim 1 : vector<8x512xf32>, i32 -> vector<8x512xf32>
    %c6 = arith.constant 6 : index
    %c0_19 = arith.constant 0 : index
    %33 = vector.load %arg5[%c6, %c0_19] : memref<9x512xf32, #tpu.memory_space<vmem>>, vector<1x512xf32>
    %34 = vector.broadcast %33 : vector<1x512xf32> to vector<8x512xf32>
    %35 = arith.mulf %32, %34 : vector<8x512xf32>
    %c448_i32 = arith.constant 448 : i32
    %36 = tpu.dynamic_rotate %11 by %c448_i32 dim 1 : vector<8x512xf32>, i32 -> vector<8x512xf32>
    %c7 = arith.constant 7 : index
    %c0_20 = arith.constant 0 : index
    %37 = vector.load %arg5[%c7, %c0_20] : memref<9x512xf32, #tpu.memory_space<vmem>>, vector<1x512xf32>
    %38 = vector.broadcast %37 : vector<1x512xf32> to vector<8x512xf32>
    %39 = arith.mulf %36, %38 : vector<8x512xf32>
    %c444_i32 = arith.constant 444 : i32
    %40 = tpu.dynamic_rotate %11 by %c444_i32 dim 1 : vector<8x512xf32>, i32 -> vector<8x512xf32>
    %c8 = arith.constant 8 : index
    %c0_21 = arith.constant 0 : index
    %41 = vector.load %arg5[%c8, %c0_21] : memref<9x512xf32, #tpu.memory_space<vmem>>, vector<1x512xf32>
    %42 = vector.broadcast %41 : vector<1x512xf32> to vector<8x512xf32>
    %43 = arith.mulf %40, %42 : vector<8x512xf32>
    %44 = tpu.concatenate %15, %19, %23, %27, %11, %31, %35, %39, %43 in 0 : vector<8x512xf32>, vector<8x512xf32>, vector<8x512xf32>, vector<8x512xf32>, vector<8x512xf32>, vector<8x512xf32>, vector<8x512xf32>, vector<8x512xf32>, vector<8x512xf32> -> vector<72x512xf32>
    %c0_22 = arith.constant 0 : index
    %c0_23 = arith.constant 0 : index
    %45 = vector.load %arg3[%c0_22, %c0_23] : memref<8x72xf32, #tpu.memory_space<vmem>>, vector<8x72xf32>
    %cst_24 = arith.constant dense<0.000000e+00> : vector<8x512xf32>
    %46 = tpu.matmul %45, %44, %cst_24 {dimension_numbers = #tpu.dot_dimension_numbers<[1], [0], [0], [1], [0, 0, 1, 1], [], []>} : vector<8x72xf32>, vector<72x512xf32>, vector<8x512xf32> -> vector<8x512xf32>
    %47 = vector.broadcast %2 : vector<8x1xf32> to vector<8x512xf32>
    %48 = arith.addf %46, %47 : vector<8x512xf32>
    %cst_25 = arith.constant 0.000000e+00 : f32
    %49 = vector.broadcast %cst_25 : f32 to vector<8x512xf32>
    %50 = arith.maximumf %48, %49 : vector<8x512xf32>
    %c68_i32_26 = arith.constant 68 : i32
    %51 = tpu.dynamic_rotate %50 by %c68_i32_26 dim 1 : vector<8x512xf32>, i32 -> vector<8x512xf32>
    %c0_27 = arith.constant 0 : index
    %c0_28 = arith.constant 0 : index
    %52 = vector.load %arg5[%c0_27, %c0_28] : memref<9x512xf32, #tpu.memory_space<vmem>>, vector<1x512xf32>
    %53 = vector.broadcast %52 : vector<1x512xf32> to vector<8x512xf32>
    %54 = arith.mulf %51, %53 : vector<8x512xf32>
    %c64_i32_29 = arith.constant 64 : i32
    %55 = tpu.dynamic_rotate %50 by %c64_i32_29 dim 1 : vector<8x512xf32>, i32 -> vector<8x512xf32>
    %c1_30 = arith.constant 1 : index
    %c0_31 = arith.constant 0 : index
    %56 = vector.load %arg5[%c1_30, %c0_31] : memref<9x512xf32, #tpu.memory_space<vmem>>, vector<1x512xf32>
    %57 = vector.broadcast %56 : vector<1x512xf32> to vector<8x512xf32>
    %58 = arith.mulf %55, %57 : vector<8x512xf32>
    %c60_i32_32 = arith.constant 60 : i32
    %59 = tpu.dynamic_rotate %50 by %c60_i32_32 dim 1 : vector<8x512xf32>, i32 -> vector<8x512xf32>
    %c2_33 = arith.constant 2 : index
    %c0_34 = arith.constant 0 : index
    %60 = vector.load %arg5[%c2_33, %c0_34] : memref<9x512xf32, #tpu.memory_space<vmem>>, vector<1x512xf32>
    %61 = vector.broadcast %60 : vector<1x512xf32> to vector<8x512xf32>
    %62 = arith.mulf %59, %61 : vector<8x512xf32>
    %c4_i32_35 = arith.constant 4 : i32
    %63 = tpu.dynamic_rotate %50 by %c4_i32_35 dim 1 : vector<8x512xf32>, i32 -> vector<8x512xf32>
    %c3_36 = arith.constant 3 : index
    %c0_37 = arith.constant 0 : index
    %64 = vector.load %arg5[%c3_36, %c0_37] : memref<9x512xf32, #tpu.memory_space<vmem>>, vector<1x512xf32>
    %65 = vector.broadcast %64 : vector<1x512xf32> to vector<8x512xf32>
    %66 = arith.mulf %63, %65 : vector<8x512xf32>
    %c508_i32_38 = arith.constant 508 : i32
    %67 = tpu.dynamic_rotate %50 by %c508_i32_38 dim 1 : vector<8x512xf32>, i32 -> vector<8x512xf32>
    %c5_39 = arith.constant 5 : index
    %c0_40 = arith.constant 0 : index
    %68 = vector.load %arg5[%c5_39, %c0_40] : memref<9x512xf32, #tpu.memory_space<vmem>>, vector<1x512xf32>
    %69 = vector.broadcast %68 : vector<1x512xf32> to vector<8x512xf32>
    %70 = arith.mulf %67, %69 : vector<8x512xf32>
    %c452_i32_41 = arith.constant 452 : i32
    %71 = tpu.dynamic_rotate %50 by %c452_i32_41 dim 1 : vector<8x512xf32>, i32 -> vector<8x512xf32>
    %c6_42 = arith.constant 6 : index
    %c0_43 = arith.constant 0 : index
    %72 = vector.load %arg5[%c6_42, %c0_43] : memref<9x512xf32, #tpu.memory_space<vmem>>, vector<1x512xf32>
    %73 = vector.broadcast %72 : vector<1x512xf32> to vector<8x512xf32>
    %74 = arith.mulf %71, %73 : vector<8x512xf32>
    %c448_i32_44 = arith.constant 448 : i32
    %75 = tpu.dynamic_rotate %50 by %c448_i32_44 dim 1 : vector<8x512xf32>, i32 -> vector<8x512xf32>
    %c7_45 = arith.constant 7 : index
    %c0_46 = arith.constant 0 : index
    %76 = vector.load %arg5[%c7_45, %c0_46] : memref<9x512xf32, #tpu.memory_space<vmem>>, vector<1x512xf32>
    %77 = vector.broadcast %76 : vector<1x512xf32> to vector<8x512xf32>
    %78 = arith.mulf %75, %77 : vector<8x512xf32>
    %c444_i32_47 = arith.constant 444 : i32
    %79 = tpu.dynamic_rotate %50 by %c444_i32_47 dim 1 : vector<8x512xf32>, i32 -> vector<8x512xf32>
    %c8_48 = arith.constant 8 : index
    %c0_49 = arith.constant 0 : index
    %80 = vector.load %arg5[%c8_48, %c0_49] : memref<9x512xf32, #tpu.memory_space<vmem>>, vector<1x512xf32>
    %81 = vector.broadcast %80 : vector<1x512xf32> to vector<8x512xf32>
    %82 = arith.mulf %79, %81 : vector<8x512xf32>
    %83 = tpu.concatenate %54, %58, %62, %66, %50, %70, %74, %78, %82 in 0 : vector<8x512xf32>, vector<8x512xf32>, vector<8x512xf32>, vector<8x512xf32>, vector<8x512xf32>, vector<8x512xf32>, vector<8x512xf32>, vector<8x512xf32>, vector<8x512xf32> -> vector<72x512xf32>
    %c0_50 = arith.constant 0 : index
    %c0_51 = arith.constant 0 : index
    %84 = vector.load %arg4[%c0_50, %c0_51] : memref<8x72xf32, #tpu.memory_space<vmem>>, vector<8x72xf32>
    %cst_52 = arith.constant dense<0.000000e+00> : vector<8x512xf32>
    %85 = tpu.matmul %84, %83, %cst_52 {dimension_numbers = #tpu.dot_dimension_numbers<[1], [0], [0], [1], [0, 0, 1, 1], [], []>} : vector<8x72xf32>, vector<72x512xf32>, vector<8x512xf32> -> vector<8x512xf32>
    %86 = vector.broadcast %3 : vector<8x1xf32> to vector<8x512xf32>
    %87 = arith.addf %85, %86 : vector<8x512xf32>
    %cst_53 = arith.constant 0.000000e+00 : f32
    %88 = vector.broadcast %cst_53 : f32 to vector<8x512xf32>
    %89 = arith.maximumf %87, %88 : vector<8x512xf32>
    %90 = vector.broadcast %4 : vector<8x1xf32> to vector<8x512xf32>
    %91 = arith.mulf %89, %90 : vector<8x512xf32>
    %cst_54 = arith.constant dense<0.000000e+00> : vector<512xf32>
    %92 = vector.multi_reduction <add>, %91, %cst_54 [0] : vector<8x512xf32> to vector<512xf32>
    %93 = vector.shape_cast %92 : vector<512xf32> to vector<1x512xf32>
    %94 = vector.broadcast %5 : vector<1x1xf32> to vector<1x512xf32>
    %95 = arith.addf %93, %94 : vector<1x512xf32>
    %c0_55 = arith.constant 0 : index
    %c0_56 = arith.constant 0 : index
    %96 = vector.load %arg7[%c0_55, %c0_56] : memref<1x512xf32, #tpu.memory_space<vmem>>, vector<1x512xf32>
    tpu.vector_store %arg7[%c0_55, %c0_56], %95 {strides = array<i32>} : memref<1x512xf32, #tpu.memory_space<vmem>>, vector<1x512xf32>,
    return
  }
  func.func @transform_0(%arg0: i32) -> (i32, i32) {
    %c0_i32 = arith.constant 0 : i32
    %c0_i32_0 = arith.constant 0 : i32
    return %c0_i32, %arg0 : i32, i32
  }
  func.func @transform_1(%arg0: i32) -> (i32, i32) {
    %c0_i32 = arith.constant 0 : i32
    %c0_i32_0 = arith.constant 0 : i32
    %c0_i32_1 = arith.constant 0 : i32
    return %c0_i32, %c0_i32_0 : i32, i32
  }
  func.func @transform_2(%arg0: i32) -> (i32, i32) {
    %c0_i32 = arith.constant 0 : i32
    %c0_i32_0 = arith.constant 0 : i32
    %c0_i32_1 = arith.constant 0 : i32
    return %c0_i32, %c0_i32_0 : i32, i32
  }
  func.func @transform_3(%arg0: i32) -> (i32, i32) {
    %c0_i32 = arith.constant 0 : i32
    %c0_i32_0 = arith.constant 0 : i32
    %c0_i32_1 = arith.constant 0 : i32
    return %c0_i32, %c0_i32_0 : i32, i32
  }
  func.func @transform_4(%arg0: i32) -> (i32, i32) {
    %c0_i32 = arith.constant 0 : i32
    %c0_i32_0 = arith.constant 0 : i32
    %c0_i32_1 = arith.constant 0 : i32
    return %c0_i32, %c0_i32_0 : i32, i32
  }
  func.func @transform_5(%arg0: i32) -> (i32, i32) {
    %c0_i32 = arith.constant 0 : i32
    %c0_i32_0 = arith.constant 0 : i32
    %c0_i32_1 = arith.constant 0 : i32
    return %c0_i32, %c0_i32_0 : i32, i32
  }
  func.func @transform_6(%arg0: i32) -> (i32, i32) {
    %c0_i32 = arith.constant 0 : i32
    %c0_i32_0 = arith.constant 0 : i32
    return %c0_i32, %arg0 : i32, i32
  }
}

</mosaic_0001>

<bundles_post_ra>
// kernel: tpu_custom_call.1
= control target key start
LH: loop header
LB: loop body
LE: loop exit
PB: predicated region body
PF: predicated region fallthrough
CT: control target
= control target key end

     0   :  { %11 = vsyncpa [#allocation3], 0  ;;  %s1549_s0 = inlined_call_operand.hbm [shape: f32[64,512], index: 0, kind: input, shape index: {}]   ;;  %s1550_s1 = inlined_call_operand.hbm [shape: f32[8,64], index: 1, kind: input, shape index: {}]   ;;  %s1551_s2 = inlined_call_operand.hbm [shape: f32[8,72], index: 2, kind: input, shape index: {}]   ;;  %s1552_s3 = inlined_call_operand.hbm [shape: f32[8,72], index: 3, kind: input, shape index: {}]   ;;  %s1553_s4 = inlined_call_operand.hbm [shape: f32[9,512], index: 4, kind: input, shape index: {}]   ;;  %s1554_s5 = inlined_call_operand.hbm [shape: f32[8,8], index: 5, kind: input, shape index: {}]   ;;  %s1555_s6 = inlined_call_operand.hbm [shape: f32[1,512], index: 6, kind: output, shape index: {}]  }
   0x1   :  { %12 = vsyncpa [#allocation6], 0 }
   0x2   :  { %13 = vsyncpa [#allocation9], 0 }
   0x3   :  { %14 = vsyncpa [#allocation12], 0  ;;  %s34_s23 = sshll.u32 %s1550_s1, 4  ;;  %s35_s23 = int_to_ptr.hbm [resolvable:$true] %s34_s23 }
   0x4   :  { %15 = vsyncpa [#allocation4], 0  ;;  %s995_s24 = smov [#allocation5]   ;;  %s56_s28 = sshll.u32 %s1552_s3, 4  ;;  %s57_s28 = int_to_ptr.hbm [resolvable:$true] %s56_s28 }
   0x5   :  { %s36_s25 = sshll.u32 %s995_s24, 4  ;;  %s996_s29 = smov [#allocation8]   ;;  %s37_s25 = int_to_ptr.vmem [resolvable:$true] %s36_s25 }
   0x6   :  { %39 = dma.hbm_to_vmem [thread:$0]  %s35_s23, 128, %s37_s25, [#allocation6]  }
   0x7   :  { %s58_s30 = sshll.u32 %s996_s29, 4  ;;  %s20_s9 = sshll.u32 %s1549_s0, 4  ;;  %s59_s30 = int_to_ptr.vmem [resolvable:$true] %s58_s30  ;;  %s21_s9 = int_to_ptr.hbm [resolvable:$true] %s20_s9 }
   0x8   :  { %61 = dma.hbm_to_vmem [thread:$0]  %s57_s28, 128, %s59_s30, [#allocation9]  }
   0x9   :  { %s997_s1 = smov [#allocation2]   ;;  %s45_s13 = sshll.u32 %s1551_s2, 4  ;;  %s46_s13 = int_to_ptr.hbm [resolvable:$true] %s45_s13 }
   0xa   :  { %s22_s10 = sshll.u32 %s997_s1, 4  ;;  %s998_s14 = smov 512   ;;  %s23_s10 = int_to_ptr.vmem [resolvable:$true] %s22_s10 }
   0xb   :  { %s999_s3 = smov 32   ;;  %s1000_s15 = smov [#allocation7]  }
   0xc   :  { %28 = dma.hbm_to_vmem [thread:$0]  %s21_s9, 4096, %s23_s10, [#allocation3], %s998_s14, %s998_s14, %s999_s3  }
   0xd   :  { %s47_s16 = sshll.u32 %s1000_s15, 4  ;;  %s66_s0 = sshll.u32 %s1553_s4, 4  ;;  %s48_s16 = int_to_ptr.vmem [resolvable:$true] %s47_s16  ;;  %s67_s0 = int_to_ptr.hbm [resolvable:$true] %s66_s0 }
   0xe   :  { %50 = dma.hbm_to_vmem [thread:$0]  %s46_s13, 128, %s48_s16, [#allocation6]  }
   0xf   :  { %s80_s21 = sshll.u32 %s1554_s5, 4  ;;  %s1001_s22 = smov [#allocation10]   ;;  %s81_s21 = int_to_ptr.hbm [resolvable:$true] %s80_s21 }
  0x10   :  { %s68_s23 = sshll.u32 %s1001_s22, 4  ;;  %s1002_s2 = smov [#allocation11]   ;;  %s69_s23 = int_to_ptr.vmem [resolvable:$true] %s68_s23 }
  0x11   :  { %74 = dma.hbm_to_vmem [thread:$0]  %s67_s0, 1024, %s69_s23, [#allocation9], %s998_s14, %s998_s14, %s999_s3  }
  0x12   :  { %s82_s24 = sshll.u32 %s1002_s2, 4  ;;  %s83_s24 = int_to_ptr.vmem [resolvable:$true] %s82_s24 }
  0x13   :  { %85 = dma.hbm_to_vmem [thread:$0]  %s81_s21, 128, %s83_s24, [#allocation12]  }
  0x14   :  { %985 = dma.done.wait [#allocation3], 4096  }
  0x15   :  { %986 = vsyncadd [#allocation3], 4294963200 }
  0x16   :  { %987 = dma.done.wait [#allocation6], 256  }
  0x17   :  { %988 = vsyncadd [#allocation6], 4294967040 }
  0x18   :  { %989 = dma.done.wait [#allocation9], 1152  }
  0x19   :  { %990 = vsyncadd [#allocation9], 4294966144 }
  0x1a   :  { %991 = dma.done.wait [#allocation12], 128  }
  0x1b   :  { %992 = vsyncadd [#allocation12], 4294967168  ;;  %v1003_v0 = vmov 0   ;;  %v138_v1 = vld [vmem:[#allocation2 + $0xe0] sm:$0xff]  ;;  %v139_v2 = vld [vmem:[#allocation2 + $0xe8] sm:$0xff]  ;;  %vm150_vm0 = vcmask 523264   ;;  %v1556_v50 = vlaneseq }
  0x1c   :  { %812 = vset.pattern.permute.xlu0 %v1003_v0  ;;  %v140_v3 = vld [vmem:[#allocation2 + $0xf0] sm:$0xff]  ;;  %162 = vmatpush.msra.mxu0 %v138_v1  ;;  %v141_v4 = vld [vmem:[#allocation2 + $0xf8] sm:$0xff]  ;;  %v134_v5 = vld [vmem:[#allocation2 + $0xc0] sm:$0xff]  ;;  %s1004_s4 = smov 68   ;;  %s1005_s5 = smov 64   ;;  %vm429_vm6 = vcmask 588800  }
  0x1d   :  { %182 = vmatpush.msra.mxu1 %v139_v2  ;;  %v135_v6 = vld [vmem:[#allocation2 + $0xc8] sm:$0xff]  ;;  %202 = vmatpush.msra.mxu2 %v140_v3  ;;  %v136_v7 = vld [vmem:[#allocation2 + $0xd0] sm:$0xff]  ;;  %v137_v8 = vld [vmem:[#allocation2 + $0xd8] sm:$0xff]  ;;  %s1006_s25 = smov 60   ;;  %s1007_s26 = smov 124   ;;  %v1121_v53 = vand.u32 127, %v1556_v50 }
  0x1e   :  { %222 = vmatpush.msra.mxu3 %v141_v4  ;;  %v130_v9 = vld [vmem:[#allocation2 + $0xa0] sm:$0xff]  ;;  %163 = vmatpush.msra.mxu0 %v134_v5  ;;  %v131_v10 = vld [vmem:[#allocation2 + $0xa8] sm:$0xff]  ;;  %v132_v11 = vld [vmem:[#allocation2 + $0xb0] sm:$0xff]  ;;  %s1008_s27 = smov 4   ;;  %vm749_vm7 = vcmask 1040384   ;;  %vm751_vm8 = vcmask 1042434  }
  0x1f   :  { %183 = vmatpush.msra.mxu1 %v135_v6  ;;  %v133_v12 = vld [vmem:[#allocation2 + $0xb8] sm:$0xff]  ;;  %203 = vmatpush.msra.mxu2 %v136_v7  ;;  %v126_v13 = vld [vmem:[#allocation2 + $0x80] sm:$0xff]  ;;  %v127_v14 = vld [vmem:[#allocation2 + $0x88] sm:$0xff]  ;;  %vm275_vm1 = vcmp.lt.s32.totalorder %v1121_v53, 64  ;;  %vm303_vm2 = vcmp.lt.s32.totalorder %v1121_v53, 60  ;;  %vm248_vm3 = vcmp.lt.s32.totalorder %v1121_v53, 68 }
  0x20   :  { %223 = vmatpush.msra.mxu3 %v137_v8  ;;  %164 = vmatpush.msra.mxu0 %v130_v9  ;;  %v128_v15 = vld [vmem:[#allocation2 + $0x90] sm:$0xff]  ;;  %v129_v16 = vld [vmem:[#allocation2 + $0x98] sm:$0xff]  ;;  %v122_v17 = vld [vmem:[#allocation2 + $0x60] sm:$0xff]  ;;  %vm359_vm4 = vcmp.lt.s32.totalorder %v1121_v53, 124  ;;  %vm331_vm5 = vcmp.lt.s32.totalorder %v1121_v53, 4  ;;  %s1013_s28 = smov [#allocation13]  }
  0x21   :  { %184 = vmatpush.msra.mxu1 %v131_v10  ;;  %204 = vmatpush.msra.mxu2 %v132_v11  ;;  %v123_v18 = vld [vmem:[#allocation2 + $0x68] sm:$0xff]  ;;  %v124_v19 = vld [vmem:[#allocation2 + $0x70] sm:$0xff]  ;;  %v125_v20 = vld [vmem:[#allocation2 + $0x78] sm:$0xff]  ;;  %s766_s29 = sshll.u32 %s1013_s28, 4  ;;  %s768_s8 = sshll.u32 %s1555_s6, 4  ;;  %vm753_vm9 = vcmask 1041408   ;;  %s767_s29 = int_to_ptr.vmem [resolvable:$true] %s766_s29  ;;  %s769_s8 = int_to_ptr.hbm [resolvable:$true] %s768_s8 }
  0x22   :  { %224 = vmatpush.msra.mxu3 %v133_v12  ;;  %165 = vmatpush.msra.mxu0 %v126_v13  ;;  %v118_v21 = vld [vmem:[#allocation2 + $0x40] sm:$0xff]  ;;  %v119_v22 = vld [vmem:[#allocation2 + $0x48] sm:$0xff]  ;;  %v120_v23 = vld [vmem:[#allocation2 + $0x50] sm:$0xff] }
  0x23   :  { %185 = vmatpush.msra.mxu1 %v127_v14  ;;  %205 = vmatpush.msra.mxu2 %v128_v15  ;;  %v121_v24 = vld [vmem:[#allocation2 + $0x58] sm:$0xff]  ;;  %v114_v25 = vld [vmem:[#allocation2 + $0x20] sm:$0xff]  ;;  %v115_v26 = vld [vmem:[#allocation2 + $0x28] sm:$0xff] }
  0x24   :  { %225 = vmatpush.msra.mxu3 %v129_v16  ;;  %166 = vmatpush.msra.mxu0 %v122_v17  ;;  %v116_v27 = vld [vmem:[#allocation2 + $0x30] sm:$0xff]  ;;  %v117_v28 = vld [vmem:[#allocation2 + $0x38] sm:$0xff]  ;;  %v110_v29 = vld [vmem:[#allocation2] sm:$0xff] }
  0x25   :  { %186 = vmatpush.msra.mxu1 %v123_v18  ;;  %206 = vmatpush.msra.mxu2 %v124_v19  ;;  %v111_v30 = vld [vmem:[#allocation2 + $0x8] sm:$0xff]  ;;  %v112_v31 = vld [vmem:[#allocation2 + $0x10] sm:$0xff]  ;;  %v113_v32 = vld [vmem:[#allocation2 + $0x18] sm:$0xff] }
  0x26   :  { %226 = vmatpush.msra.mxu3 %v125_v20  ;;  %167 = vmatpush.msra.mxu0 %v118_v21  ;;  %v144_v33 = vld [vmem:[#allocation5] sm:$0xff]  ;;  %v1067_v34 = vld [vmem:[#allocation11] sm:$0xff] }
  0x27   :  { %187 = vmatpush.msra.mxu1 %v119_v22  ;;  %207 = vmatpush.msra.mxu2 %v120_v23  ;;  %v1123_v54 = vld [vmem:[#allocation10 + $0x20] ss:$8 sm:$0xf]  ;;  %v1125_v56 = vld [vmem:[#allocation10 + $0x7] ss:$8 sm:$0xf] }
  0x28   :  { %227 = vmatpush.msra.mxu3 %v121_v24  ;;  %168 = vmatpush.msra.mxu0 %v114_v25  ;;  %v412_v57 = vperm.slane %v1123_v54, 0  ;;  %v1130_v58 = vld [vmem:[#allocation10 + $0x6] ss:$8 sm:$0xf]  ;;  %v397_v60 = vperm.slane %v1125_v56, 0  ;;  %v413_v8 = vperm.slane %v1123_v54, 1 }
  0x29   :  { %188 = vmatpush.msra.mxu1 %v115_v26  ;;  %208 = vmatpush.msra.mxu2 %v116_v27  ;;  %v382_v1 = vperm.slane %v1130_v58, 0  ;;  %v398_v11 = vperm.slane %v1125_v56, 1  ;;  %v383_v16 = vperm.slane %v1130_v58, 1  ;;  %v414_v20 = vperm.slane %v1123_v54, 2 }
  0x2a   :  { %228 = vmatpush.msra.mxu3 %v117_v28  ;;  %169 = vmatpush.msra.mxu0 %v110_v29  ;;  %v415_v21 = vperm.slane %v1123_v54, 3  ;;  %v399_v23 = vperm.slane %v1125_v56, 2  ;;  %v400_v24 = vperm.slane %v1125_v56, 3  ;;  %v1009_v25 = vmov 1  }
  0x2b   :  { %189 = vmatpush.msra.mxu1 %v111_v30  ;;  %209 = vmatpush.msra.mxu2 %v112_v31 }
  0x2c   :  { %229 = vmatpush.msra.mxu3 %v113_v32  ;;  %781 = vmatmul.msk.f32.vlgmr.msra.gmra.mxu0 %vm150_vm0, %v144_v33 }
  0x2d   :  { %782 = vmatmul.msk.f32.vlgmr.msra.gmra.mxu1 %vm150_vm0, %v144_v33  ;;  %783 = vmatmul.msk.f32.vlgmr.msra.gmra.mxu2 %vm150_vm0, %v144_v33 }
  0x2e   :  { %784 = vmatmul.msk.f32.vlgmr.msra.gmra.mxu3 %vm150_vm0, %v144_v33  ;;  %147 = vperm.xlu0 %812, %v1067_v34   ;;  %v384_v33 = vperm.slane %v1130_v58, 2 }
  0x36   :  { %813 = vset.pattern.permute.xlu0 %v1009_v25 }
  0xa0   :  { %v148_v35 = vpop.permute.xlu0 %147 }
  0xa9   :  { %v171_v36 = vpop.f32.mrf.mxu0 }
  0xaa   :  { %v172_v37 = vadd.f32 %v171_v36, %v148_v35  ;;  %v191_v39 = vpop.f32.mrf.mxu1 }
  0xab   :  { %v192_v40 = vadd.f32 %v191_v39, %v148_v35  ;;  %v1216_v39 = vld [vmem:[#allocation10 + $0x5] ss:$8 sm:$0xf] }
  0xac   :  { %v1070_v38 = vmax.f32 %v172_v37, 0.0 }
  0xad   :  { %v1078_v41 = vmax.f32 %v192_v40, 0.0 }
  0xae   :  { %238 = vrot.lane.b32.xlu1 %v1070_v38, %s1004_s4  ;;  %267 = vrot.lane.b32.xlu2 %v1070_v38, %s1005_s5 }
  0xaf   :  { %295 = vrot.lane.b32.xlu0 %v1070_v38, %s1006_s25 }
  0xb0   :  { %v211_v44 = vpop.f32.mrf.mxu2 }
  0xb1   :  { %v231_v42 = vpop.f32.mrf.mxu3  ;;  %v212_v46 = vadd.f32 %v211_v44, %v148_v35 }
  0xb2   :  { %v232_v43 = vadd.f32 %v231_v42, %v148_v35  ;;  %v385_v35 = vperm.slane %v1130_v58, 3 }
  0xb3   :  { %v1094_v47 = vmax.f32 %v212_v46, 0.0 }
  0xb4   :  { %v1086_v45 = vmax.f32 %v232_v43, 0.0 }
  0xb6   :  { %297 = vrot.lane.b32.xlu1 %v1078_v41, %s1006_s25  ;;  %351 = vrot.lane.b32.xlu2 %v1070_v38, %s1007_s26 }
  0xb7   :  { %240 = vrot.lane.b32.xlu0 %v1078_v41, %s1004_s4 }
  0xbe   :  { %325 = vrot.lane.b32.xlu1 %v1078_v41, %s1008_s27  ;;  %269 = vrot.lane.b32.xlu2 %v1078_v41, %s1005_s5 }
  0xbf   :  { %273 = vrot.lane.b32.xlu0 %v1086_v45, %s1005_s5 }
  0xc6   :  { %299 = vrot.lane.b32.xlu1 %v1094_v47, %s1006_s25  ;;  %271 = vrot.lane.b32.xlu2 %v1094_v47, %s1005_s5 }
  0xc7   :  { %244 = vrot.lane.b32.xlu0 %v1086_v45, %s1004_s4 }
  0xce   :  { %301 = vrot.lane.b32.xlu1 %v1086_v45, %s1006_s25  ;;  %242 = vrot.lane.b32.xlu2 %v1094_v47, %s1004_s4 }
  0xcf   :  { %355 = vrot.lane.b32.xlu0 %v1094_v47, %s1007_s26 }
  0xd6   :  { %357 = vrot.lane.b32.xlu1 %v1086_v45, %s1007_s26  ;;  %327 = vrot.lane.b32.xlu2 %v1094_v47, %s1008_s27 }
  0xd7   :  { %329 = vrot.lane.b32.xlu0 %v1086_v45, %s1008_s27 }
  0xde   :  { %353 = vrot.lane.b32.xlu1 %v1078_v41, %s1007_s26  ;;  %323 = vrot.lane.b32.xlu2 %v1070_v38, %s1008_s27 }
  0xdf   :  { %426 = vperm.xlu0 %813, %v1067_v34  }
 0x108   :  { %v268_v48 = vpop.permute.xlu2 %267 }
 0x110   :  { %v1118_v49 = vpop.permute.xlu2 %351 }
 0x118   :  { %v270_v55 = vpop.permute.xlu2 %269 }
 0x119   :  { %v1136_v61 = vsel %vm275_vm1, %v268_v48, %v270_v55 }
 0x11a   :  { %v405_v3 = vmul.f32 %v397_v60, %v1136_v61 }
 0x120   :  { %v239_v51 = vpop.permute.xlu1 %238  ;;  %v272_v4 = vpop.permute.xlu2 %271 }
 0x121   :  { %v296_v52 = vpop.permute.xlu0 %295  ;;  %v1162_v12 = vsel %vm275_vm1, %v270_v55, %v272_v4 }
 0x122   :  { %v406_v18 = vmul.f32 %v398_v11, %v1162_v12 }
 0x128   :  { %v298_v59 = vpop.permute.xlu1 %297  ;;  %v243_v9 = vpop.permute.xlu2 %242 }
 0x129   :  { %v1140_v62 = vsel %vm303_vm2, %v296_v52, %v298_v59  ;;  %v241_v63 = vpop.permute.xlu0 %240 }
 0x12a   :  { %v420_v0 = vmul.f32 %v412_v57, %v1140_v62  ;;  %v1148_v2 = vsel %vm248_vm3, %v239_v51, %v241_v63  ;;  %v1174_v17 = vsel %vm248_vm3, %v241_v63, %v243_v9 }
 0x12b   :  { %v390_v5 = vmul.f32 %v382_v1, %v1148_v2  ;;  %v391_v19 = vmul.f32 %v383_v16, %v1174_v17 }
 0x12c   :  { %440 = vmatpush.msrb.mxu0 %v420_v0 }
 0x12e   :  { %441 = vmatpush.msrb.mxu0 %v405_v3 }
 0x130   :  { %v1156_v6 = vpop.permute.xlu1 %325  ;;  %442 = vmatpush.msrb.mxu0 %v390_v5  ;;  %v328_v43 = vpop.permute.xlu2 %327 }
 0x131   :  { %v274_v7 = vpop.permute.xlu0 %273 }
 0x132   :  { %v1188_v26 = vsel %vm275_vm1, %v272_v4, %v274_v7  ;;  %v1192_v27 = vsel %vm275_vm1, %v274_v7, %v268_v48  ;;  %v369_v48 = vperm.slane %v1216_v39, 2 }
 0x133   :  { %v407_v40 = vmul.f32 %v399_v23, %v1188_v26  ;;  %v408_v42 = vmul.f32 %v400_v24, %v1192_v27 }
 0x138   :  { %v300_v10 = vpop.permute.xlu1 %299 }
 0x139   :  { %v1166_v13 = vsel %vm303_vm2, %v298_v59, %v300_v10  ;;  %v245_v14 = vpop.permute.xlu0 %244 }
 0x13a   :  { %v421_v15 = vmul.f32 %v413_v8, %v1166_v13  ;;  %v1210_v36 = vsel %vm248_vm3, %v243_v9, %v245_v14  ;;  %v1214_v37 = vsel %vm248_vm3, %v245_v14, %v239_v51  ;;  %v370_v51 = vperm.slane %v1216_v39, 3  ;;  %v1252_v14 = vld [vmem:[#allocation10 + $0x2] ss:$8 sm:$0xf] }
 0x13b   :  { %v392_v44 = vmul.f32 %v384_v33, %v1210_v36  ;;  %v393_v46 = vmul.f32 %v385_v35, %v1214_v37  ;;  %v333_v9 = vsel %vm331_vm5, %v1156_v6, %v328_v43 }
 0x13c   :  { %460 = vmatpush.msrb.mxu1 %v421_v15  ;;  %v313_v15 = vperm.slane %v1252_v14, 2 }
 0x13e   :  { %461 = vmatpush.msrb.mxu1 %v406_v18  ;;  %v314_v18 = vperm.slane %v1252_v14, 3 }
 0x140   :  { %v302_v22 = vpop.permute.xlu1 %301  ;;  %462 = vmatpush.msrb.mxu1 %v391_v19  ;;  %v1256_v19 = vld [vmem:[#allocation10 + $0x1] ss:$8 sm:$0xf] }
 0x141   :  { %v304_v28 = vsel %vm303_vm2, %v300_v10, %v302_v22  ;;  %v1198_v29 = vsel %vm303_vm2, %v302_v22, %v296_v52  ;;  %v356_v30 = vpop.permute.xlu0 %355  ;;  %v1233_v52 = vld [vmem:[#allocation10 + $0x3] ss:$8 sm:$0xf] }
 0x142   :  { %v422_v31 = vmul.f32 %v414_v20, %v304_v28  ;;  %v423_v32 = vmul.f32 %v415_v21, %v1198_v29  ;;  %v341_v5 = vperm.slane %v1233_v52, 2  ;;  %v342_v7 = vperm.slane %v1233_v52, 3 }
 0x144   :  { %480 = vmatpush.msrb.mxu2 %v422_v31  ;;  %500 = vmatpush.msrb.mxu3 %v423_v32  ;;  %v349_v22 = vmul.f32 %v341_v5, %v333_v9  ;;  %v367_v31 = vperm.slane %v1216_v39, 0  ;;  %v368_v32 = vperm.slane %v1216_v39, 1 }
 0x146   :  { %481 = vmatpush.msrb.mxu2 %v407_v40  ;;  %501 = vmatpush.msrb.mxu3 %v408_v42  ;;  %v1266_v40 = vld [vmem:[#allocation10] ss:$8 sm:$0xf]  ;;  %v285_v42 = vperm.slane %v1256_v19, 2 }
 0x148   :  { %v358_v55 = vpop.permute.xlu1 %357  ;;  %482 = vmatpush.msrb.mxu2 %v392_v44  ;;  %502 = vmatpush.msrb.mxu3 %v393_v46  ;;  %v324_v44 = vpop.permute.xlu2 %323  ;;  %v322_v46 = vmul.f32 %v314_v18, %v304_v28  ;;  %v339_v28 = vperm.slane %v1233_v52, 0 }
 0x149   :  { %v360_v59 = vsel %vm359_vm4, %v356_v30, %v358_v55  ;;  %v363_v63 = vsel %vm359_vm4, %v358_v55, %v1118_v49  ;;  %v330_v0 = vpop.permute.xlu0 %329 }
 0x14a   :  { %v377_v3 = vmul.f32 %v369_v48, %v360_v59  ;;  %v378_v4 = vmul.f32 %v370_v51, %v363_v63  ;;  %v332_v10 = vsel %vm331_vm5, %v328_v43, %v330_v0  ;;  %v286_v43 = vperm.slane %v1256_v19, 3 }
 0x14b   :  { %v350_v25 = vmul.f32 %v342_v7, %v332_v10  ;;  %v257_v63 = vperm.slane %v1266_v40, 2  ;;  %v335_v9 = vsel %vm331_vm5, %v330_v0, %v324_v44  ;;  %v293_v10 = vmul.f32 %v285_v42, %v1162_v12 }
 0x14c   :  { %483 = vmatpush.msrb.mxu2 %v377_v3  ;;  %503 = vmatpush.msrb.mxu3 %v378_v4  ;;  %v258_v3 = vperm.slane %v1266_v40, 3  ;;  %v284_v0 = vperm.slane %v1256_v19, 1 }
 0x14e   :  { %484 = vmatpush.msrb.mxu2 %v1094_v47  ;;  %504 = vmatpush.msrb.mxu3 %v1086_v45  ;;  %v321_v45 = vmul.f32 %v313_v15, %v1166_v13  ;;  %v266_v12 = vmul.f32 %v258_v3, %v1210_v36  ;;  %v255_v36 = vperm.slane %v1266_v40, 0 }
 0x150   :  { %v354_v47 = vpop.permute.xlu1 %353  ;;  %485 = vmatpush.msrb.mxu2 %v349_v22  ;;  %505 = vmatpush.msrb.mxu3 %v350_v25  ;;  %v294_v22 = vmul.f32 %v286_v43, %v1188_v26  ;;  %v311_v25 = vperm.slane %v1252_v14, 0  ;;  %v347_v26 = vmul.f32 %v339_v28, %v335_v9 }
 0x151   :  { %v361_v55 = vsel %vm359_vm4, %v354_v47, %v356_v30  ;;  %v362_v59 = vsel %vm359_vm4, %v1118_v49, %v354_v47  ;;  %v340_v30 = vperm.slane %v1233_v52, 1  ;;  %v334_v49 = vsel %vm331_vm5, %v324_v44, %v1156_v6 }
 0x152   :  { %486 = vmatpush.msrb.mxu2 %v321_v45  ;;  %506 = vmatpush.msrb.mxu3 %v322_v46  ;;  %v375_v4 = vmul.f32 %v367_v31, %v362_v59  ;;  %v376_v13 = vmul.f32 %v368_v32, %v361_v55  ;;  %v312_v47 = vperm.slane %v1252_v14, 1  ;;  %v265_v6 = vmul.f32 %v257_v63, %v1174_v17  ;;  %v424_v45 = vld [vmem:[#allocation7] sm:$0xff] }
 0x153   :  { %v348_v44 = vmul.f32 %v340_v30, %v334_v49  ;;  %v283_v17 = vperm.slane %v1256_v19, 0  ;;  %v256_v46 = vperm.slane %v1266_v40, 1 }
 0x154   :  { %443 = vmatpush.msrb.mxu0 %v375_v4  ;;  %463 = vmatpush.msrb.mxu1 %v376_v13 }
 0x155   :  { %487 = vmatpush.msrb.mxu2 %v293_v10  ;;  %507 = vmatpush.msrb.mxu3 %v294_v22  ;;  %v291_v55 = vmul.f32 %v283_v17, %v1192_v27  ;;  %v264_v59 = vmul.f32 %v256_v46, %v1148_v2  ;;  %v427_v27 = vpop.permute.xlu0 %426 }
 0x156   :  { %444 = vmatpush.msrb.mxu0 %v1070_v38  ;;  %464 = vmatpush.msrb.mxu1 %v1078_v41  ;;  %v319_v38 = vmul.f32 %v311_v25, %v1198_v29  ;;  %v320_v41 = vmul.f32 %v312_v47, %v1140_v62  ;;  %v292_v29 = vmul.f32 %v284_v0, %v1136_v61 }
 0x157   :  { %488 = vmatpush.msrb.mxu2 %v265_v6  ;;  %508 = vmatpush.msrb.mxu3 %v266_v12  ;;  %v263_v62 = vmul.f32 %v255_v36, %v1214_v37 }
 0x158   :  { %445 = vmatpush.msrb.mxu0 %v347_v26  ;;  %465 = vmatpush.msrb.mxu1 %v348_v44 }
 0x159   :  { %787 = vmatmul.msk.f32.vlgmr.msrb.gmra.mxu2 %vm429_vm6, %v424_v45  ;;  %788 = vmatmul.msk.f32.vlgmr.msrb.gmra.mxu3 %vm429_vm6, %v424_v45 }
 0x15a   :  { %446 = vmatpush.msrb.mxu0 %v319_v38  ;;  %466 = vmatpush.msrb.mxu1 %v320_v41 }
 0x15c   :  { %447 = vmatpush.msrb.mxu0 %v291_v55  ;;  %467 = vmatpush.msrb.mxu1 %v292_v29 }
 0x15e   :  { %448 = vmatpush.msrb.mxu0 %v263_v62  ;;  %468 = vmatpush.msrb.mxu1 %v264_v59 }
 0x15f   :  { %785 = vmatmul.msk.f32.vlgmr.msrb.gmra.mxu0 %vm429_vm6, %v424_v45  ;;  %786 = vmatmul.msk.f32.vlgmr.msrb.gmra.mxu1 %vm429_vm6, %v424_v45 }
 0x1dc   :  { %v450_v4 = vpop.f32.mrf.mxu0  ;;  %v470_v49 = vpop.f32.mrf.mxu1 }
 0x1dd   :  { %v451_v13 = vadd.f32 %v450_v4, %v427_v27  ;;  %v471_v2 = vadd.f32 %v470_v49, %v427_v27  ;;  %v490_v9 = vpop.f32.mrf.mxu2  ;;  %v510_v10 = vpop.f32.mrf.mxu3 }
 0x1de   :  { %v491_v22 = vadd.f32 %v490_v9, %v427_v27  ;;  %v511_v6 = vadd.f32 %v510_v10, %v427_v27 }
 0x1df   :  { %v1339_v61 = vmax.f32 %v451_v13, 0.0  ;;  %v1347_v37 = vmax.f32 %v471_v2, 0.0 }
 0x1e0   :  { %v1355_v12 = vmax.f32 %v491_v22, 0.0  ;;  %v1357_v26 = vmax.f32 %v511_v6, 0.0 }
 0x1e1   :  { %581 = vrot.lane.b32.xlu0 %v1339_v61, %s1007_s26  ;;  %533 = vrot.lane.b32.xlu2 %v1339_v61, %s1005_s5 }
 0x1e2   :  { %549 = vrot.lane.b32.xlu1 %v1339_v61, %s1006_s25 }
 0x1e9   :  { %535 = vrot.lane.b32.xlu0 %v1347_v37, %s1005_s5  ;;  %517 = vrot.lane.b32.xlu2 %v1339_v61, %s1004_s4 }
 0x1ea   :  { %519 = vrot.lane.b32.xlu1 %v1347_v37, %s1004_s4 }
 0x1f1   :  { %537 = vrot.lane.b32.xlu0 %v1355_v12, %s1005_s5  ;;  %551 = vrot.lane.b32.xlu2 %v1347_v37, %s1006_s25 }
 0x1f2   :  { %555 = vrot.lane.b32.xlu1 %v1357_v26, %s1006_s25 }
 0x1f9   :  { %521 = vrot.lane.b32.xlu0 %v1355_v12, %s1004_s4  ;;  %567 = vrot.lane.b32.xlu2 %v1347_v37, %s1008_s27 }
 0x1fa   :  { %539 = vrot.lane.b32.xlu1 %v1357_v26, %s1005_s5 }
 0x201   :  { %569 = vrot.lane.b32.xlu0 %v1355_v12, %s1008_s27  ;;  %553 = vrot.lane.b32.xlu2 %v1355_v12, %s1006_s25 }
 0x202   :  { %523 = vrot.lane.b32.xlu1 %v1357_v26, %s1004_s4 }
 0x209   :  { %565 = vrot.lane.b32.xlu0 %v1339_v61, %s1008_s27  ;;  %587 = vrot.lane.b32.xlu2 %v1357_v26, %s1007_s26 }
 0x20a   :  { %585 = vrot.lane.b32.xlu1 %v1355_v12, %s1007_s26 }
 0x211   :  { %583 = vrot.lane.b32.xlu2 %v1347_v37, %s1007_s26 }
 0x212   :  { %571 = vrot.lane.b32.xlu1 %v1357_v26, %s1008_s27 }
 0x23b   :  { %v534_v44 = vpop.permute.xlu2 %533 }
 0x243   :  { %v518_v45 = vpop.permute.xlu2 %517 }
 0x24b   :  { %v552_v38 = vpop.permute.xlu2 %551 }
 0x253   :  { %v582_v41 = vpop.permute.xlu0 %581  ;;  %v1387_v55 = vpop.permute.xlu2 %567 }
 0x254   :  { %v550_v29 = vpop.permute.xlu1 %549 }
 0x255   :  { %v1391_v62 = vsel %vm303_vm2, %v550_v29, %v552_v38 }
 0x256   :  { %v605_v59 = vmul.f32 %v1391_v62, %v412_v57  ;;  %v562_v39 = vmul.f32 %v1391_v62, %v312_v47 }
 0x258   :  { %624 = vmatpush.msra.mxu0 %v605_v59 }
 0x25b   :  { %v536_v27 = vpop.permute.xlu0 %535  ;;  %v554_v4 = vpop.permute.xlu2 %553 }
 0x25c   :  { %v1398_v13 = vsel %vm275_vm1, %v534_v44, %v536_v27  ;;  %v1402_v49 = vsel %vm303_vm2, %v552_v38, %v554_v4  ;;  %v520_v2 = vpop.permute.xlu1 %519 }
 0x25d   :  { %v601_v9 = vmul.f32 %v1398_v13, %v397_v60  ;;  %v606_v57 = vmul.f32 %v1402_v49, %v413_v8  ;;  %v1412_v10 = vsel %vm248_vm3, %v518_v45, %v520_v2 }
 0x25e   :  { %v597_v22 = vmul.f32 %v1412_v10, %v382_v1  ;;  %v530_v53 = vmul.f32 %v1412_v10, %v256_v46 }
 0x25f   :  { %625 = vmatpush.msra.mxu0 %v601_v9  ;;  %644 = vmatpush.msra.mxu1 %v606_v57 }
 0x261   :  { %626 = vmatpush.msra.mxu0 %v597_v22 }
 0x263   :  { %v538_v6 = vpop.permute.xlu0 %537  ;;  %v588_v38 = vpop.permute.xlu2 %587 }
 0x264   :  { %v1419_v60 = vsel %vm275_vm1, %v536_v27, %v538_v6  ;;  %v556_v59 = vpop.permute.xlu1 %555  ;;  %v592_v56 = vsel %vm359_vm4, %v588_v38, %v582_v41 }
 0x265   :  { %v602_v8 = vmul.f32 %v1419_v60, %v398_v11  ;;  %v1426_v50 = vsel %vm303_vm2, %v554_v4, %v556_v59  ;;  %v1430_v1 = vsel %vm303_vm2, %v556_v59, %v550_v29 }
 0x266   :  { %v607_v9 = vmul.f32 %v1426_v50, %v414_v20  ;;  %v608_v27 = vmul.f32 %v1430_v1, %v415_v21  ;;  %v564_v52 = vmul.f32 %v1426_v50, %v314_v18 }
 0x267   :  { %645 = vmatpush.msra.mxu1 %v602_v8 }
 0x268   :  { %664 = vmatpush.msra.mxu2 %v607_v9  ;;  %684 = vmatpush.msra.mxu3 %v608_v27  ;;  %v1012_v9 = vmov 3  }
 0x269   :  { %815 = vset.pattern.permute.xlu2 %v1012_v9 }
 0x26a   :  { %702 = vperm.xlu2 %815, %v1067_v34  }
 0x26b   :  { %v522_v11 = vpop.permute.xlu0 %521  ;;  %v584_v57 = vpop.permute.xlu2 %583 }
 0x26c   :  { %v1440_v4 = vsel %vm248_vm3, %v520_v2, %v522_v11  ;;  %v591_v29 = vsel %vm359_vm4, %v582_v41, %v584_v57  ;;  %v540_v22 = vpop.permute.xlu1 %539 }
 0x26d   :  { %v598_v20 = vmul.f32 %v1440_v4, %v383_v16  ;;  %v593_v54 = vmul.f32 %v591_v29, %v367_v31  ;;  %v1451_v21 = vsel %vm275_vm1, %v538_v6, %v540_v22  ;;  %v1455_v59 = vsel %vm275_vm1, %v540_v22, %v534_v44  ;;  %v143_v16 = vld [vmem:[#allocation11] sm:$0x1] }
 0x26e   :  { %v603_v2 = vmul.f32 %v1451_v21, %v399_v23  ;;  %v604_v8 = vmul.f32 %v1455_v59, %v400_v24  ;;  %v1010_v31 = vmov 2   ;;  %v1011_v6 = vmov 4  }
 0x26f   :  { %627 = vmatpush.msra.mxu0 %v593_v54  ;;  %646 = vmatpush.msra.mxu1 %v598_v20  ;;  %v596_v22 = vmul.f32 %v592_v56, %v370_v51 }
 0x270   :  { %665 = vmatpush.msra.mxu2 %v603_v2  ;;  %685 = vmatpush.msra.mxu3 %v604_v8 }
 0x271   :  { %628 = vmatpush.msra.mxu0 %v1339_v61  ;;  %814 = vset.pattern.permute.xlu1 %v1010_v31 }
 0x272   :  { %816 = vset.pattern.permute.xlu0 %v1011_v6  ;;  %611 = vperm.xlu1 %814, %v1067_v34  }
 0x273   :  { %v570_v44 = vpop.permute.xlu0 %569  ;;  %735 = vperm.xlu0 %816, %v143_v16  }
 0x274   :  { %v524_v23 = vpop.permute.xlu1 %523 }
 0x275   :  { %v525_v24 = vsel %vm248_vm3, %v522_v11, %v524_v23  ;;  %v528_v61 = vsel %vm248_vm3, %v524_v23, %v518_v45 }
 0x276   :  { %v599_v27 = vmul.f32 %v525_v24, %v384_v33  ;;  %v600_v29 = vmul.f32 %v528_v61, %v385_v35  ;;  %v574_v35 = vsel %vm331_vm5, %v1387_v55, %v570_v44  ;;  %v529_v50 = vmul.f32 %v528_v61, %v255_v36 }
 0x277   :  { %v532_v14 = vmul.f32 %v525_v24, %v258_v3 }
 0x278   :  { %666 = vmatpush.msra.mxu2 %v599_v27  ;;  %686 = vmatpush.msra.mxu3 %v600_v29 }
 0x27a   :  { %687 = vmatpush.msra.mxu3 %v596_v22 }
 0x27b   :  { %v566_v41 = vpop.permute.xlu0 %565 }
 0x27c   :  { %688 = vmatpush.msra.mxu3 %v1357_v26  ;;  %v586_v11 = vpop.permute.xlu1 %585  ;;  %v575_v51 = vsel %vm331_vm5, %v566_v41, %v1387_v55  ;;  %v579_v26 = vmul.f32 %v574_v35, %v341_v5 }
 0x27d   :  { %v589_v45 = vsel %vm359_vm4, %v586_v11, %v588_v38  ;;  %v590_v34 = vsel %vm359_vm4, %v584_v57, %v586_v11  ;;  %v578_v38 = vmul.f32 %v575_v51, %v340_v30 }
 0x27e   :  { %v594_v58 = vmul.f32 %v590_v34, %v368_v32  ;;  %v595_v33 = vmul.f32 %v589_v45, %v369_v48  ;;  %v563_v48 = vmul.f32 %v1402_v49, %v313_v15  ;;  %v547_v15 = vmul.f32 %v1419_v60, %v285_v42  ;;  %v609_v42 = vld [vmem:[#allocation8] sm:$0xff] }
 0x280   :  { %647 = vmatpush.msra.mxu1 %v594_v58  ;;  %667 = vmatpush.msra.mxu2 %v595_v33 }
 0x282   :  { %648 = vmatpush.msra.mxu1 %v1347_v37  ;;  %668 = vmatpush.msra.mxu2 %v1355_v12  ;;  %v546_v37 = vmul.f32 %v1398_v13, %v284_v0  ;;  %v561_v0 = vmul.f32 %v1430_v1, %v311_v25  ;;  %v548_v25 = vmul.f32 %v1451_v21, %v286_v43 }
 0x284   :  { %649 = vmatpush.msra.mxu1 %v578_v38  ;;  %669 = vmatpush.msra.mxu2 %v579_v26  ;;  %v572_v32 = vpop.permute.xlu1 %571 }
 0x285   :  { %v573_v5 = vsel %vm331_vm5, %v570_v44, %v572_v32  ;;  %v576_v30 = vsel %vm331_vm5, %v572_v32, %v566_v41 }
 0x286   :  { %v577_v47 = vmul.f32 %v576_v30, %v339_v28  ;;  %v580_v12 = vmul.f32 %v573_v5, %v342_v7  ;;  %650 = vmatpush.msra.mxu1 %v562_v39  ;;  %670 = vmatpush.msra.mxu2 %v563_v48  ;;  %v531_v7 = vmul.f32 %v1440_v4, %v257_v63  ;;  %v1557_v30 = vlaneseq }
 0x287   :  { %v545_v28 = vmul.f32 %v1455_v59, %v283_v17 }
 0x288   :  { %629 = vmatpush.msra.mxu0 %v577_v47  ;;  %651 = vmatpush.msra.mxu1 %v546_v37  ;;  %vm758_vm10 = vcmp.lt.s32.totalorder %v1557_v30, 512 }
 0x289   :  { %671 = vmatpush.msra.mxu2 %v547_v15  ;;  %689 = vmatpush.msra.mxu3 %v580_v12 }
 0x28a   :  { %630 = vmatpush.msra.mxu0 %v561_v0  ;;  %652 = vmatpush.msra.mxu1 %v530_v53 }
 0x28b   :  { %672 = vmatpush.msra.mxu2 %v531_v7  ;;  %690 = vmatpush.msra.mxu3 %v564_v52 }
 0x28c   :  { %791 = vmatmul.msk.f32.vlgmr.msra.gmra.mxu2 %vm429_vm6, %v609_v42  ;;  %631 = vmatpush.msra.mxu0 %v545_v28 }
 0x28d   :  { %691 = vmatpush.msra.mxu3 %v548_v25  ;;  %790 = vmatmul.msk.f32.vlgmr.msra.gmra.mxu1 %vm429_vm6, %v609_v42 }
 0x28e   :  { %632 = vmatpush.msra.mxu0 %v529_v50 }
 0x28f   :  { %692 = vmatpush.msra.mxu3 %v532_v14  ;;  %789 = vmatmul.msk.f32.vlgmr.msra.gmra.mxu0 %vm429_vm6, %v609_v42 }
 0x290   :  { %792 = vmatmul.msk.f32.vlgmr.msra.gmra.mxu3 %vm429_vm6, %v609_v42 }
 0x2c4   :  { %v703_v17 = vpop.permute.xlu2 %702 }
 0x2e4   :  { %v612_v18 = vpop.permute.xlu1 %611 }
 0x2e5   :  { %v736_v11 = vpop.permute.xlu0 %735 }
 0x30a   :  { %v654_v19 = vpop.f32.mrf.mxu1 }
 0x30b   :  { %v655_v43 = vadd.f32 %v654_v19, %v612_v18 }
 0x30c   :  { %v634_v63 = vpop.f32.mrf.mxu0 }
 0x30d   :  { %v698_v36 = vmax.f32 %v655_v43, 0.0  ;;  %v635_v46 = vadd.f32 %v634_v63, %v612_v18 }
 0x30f   :  { %v697_v55 = vmax.f32 %v635_v46, 0.0  ;;  %v706_v62 = vmul.f32 %v703_v17, %v698_v36  ;;  %v674_v40 = vpop.f32.mrf.mxu2 }
 0x310   :  { %v675_v3 = vadd.f32 %v674_v40, %v612_v18 }
 0x311   :  { %v705_v13 = vmul.f32 %v703_v17, %v697_v55  ;;  %v715_v49 = vrot.slane %v706_v62, 4 }
 0x312   :  { %v699_v10 = vmax.f32 %v675_v3, 0.0 }
 0x313   :  { %v709_v60 = vrot.slane %v705_v13, 4  ;;  %v716_v1 = vadd.f32 %v715_v49, %v706_v62  ;;  %v694_v57 = vpop.f32.mrf.mxu3 }
 0x314   :  { %v707_v4 = vmul.f32 %v703_v17, %v699_v10  ;;  %v695_v20 = vadd.f32 %v694_v57, %v612_v18 }
 0x315   :  { %v710_v54 = vadd.f32 %v709_v60, %v705_v13  ;;  %v717_v21 = vrot.slane %v716_v1, 2 }
 0x316   :  { %v721_v59 = vrot.slane %v707_v4, 4  ;;  %v700_v2 = vmax.f32 %v695_v20, 0.0 }
 0x317   :  { %v711_v8 = vrot.slane %v710_v54, 2  ;;  %v718_v16 = vadd.f32 %v717_v21, %v716_v1 }
 0x318   :  { %v722_v31 = vadd.f32 %v721_v59, %v707_v4  ;;  %v708_v6 = vmul.f32 %v703_v17, %v700_v2 }
 0x319   :  { %v712_v9 = vadd.f32 %v711_v8, %v710_v54  ;;  %v719_v56 = vrot.slane %v718_v16, 1 }
 0x31a   :  { %v723_v44 = vrot.slane %v722_v31, 2  ;;  %v727_v23 = vrot.slane %v708_v6, 4 }
 0x31b   :  { %v713_v29 = vrot.slane %v712_v9, 1  ;;  %v720_v22 = vadd.f32 %v719_v56, %v718_v16 }
 0x31c   :  { %v724_v24 = vadd.f32 %v723_v44, %v722_v31  ;;  %v728_v61 = vadd.f32 %v727_v23, %v708_v6 }
 0x31d   :  { %v714_v58 = vadd.f32 %v713_v29, %v712_v9  ;;  %v739_v35 = vadd.f32 %v736_v11, %v720_v22 }
 0x31e   :  { %v729_v27 = vrot.slane %v728_v61, 2  ;;  %v725_v41 = vrot.slane %v724_v24, 1 }
 0x31f   :  { %v738_v38 = vadd.f32 %v736_v11, %v714_v58  ;;  %v746_v48 = vrot.slane %v739_v35, 7 }
 0x320   :  { %v730_v45 = vadd.f32 %v729_v27, %v728_v61  ;;  %v726_v34 = vadd.f32 %v725_v41, %v724_v24 }
 0x321   :  { %v750_v37 = vsel %vm749_vm7, %v738_v38, %v746_v48 }
 0x322   :  { %v731_v33 = vrot.slane %v730_v45, 1  ;;  %v740_v26 = vadd.f32 %v736_v11, %v726_v34 }
 0x324   :  { %v732_v51 = vadd.f32 %v731_v33, %v730_v45  ;;  %v747_v32 = vrot.slane %v740_v26, 6 }
 0x326   :  { %v741_v39 = vadd.f32 %v736_v11, %v732_v51 }
 0x328   :  { %v748_v5 = vrot.slane %v741_v39, 5 }
 0x32a   :  { %v752_v47 = vsel %vm751_vm8, %v747_v32, %v748_v5 }
 0x32b   :  { %v754_v12 = vsel %vm753_vm9, %v750_v37, %v752_v47 }
 0x32c   :  { %760 = vst.msk [vmem:[#allocation13] sm:$0xf] %vm758_vm10, %v754_v12 }
 0x32d   :  { %771 = dma.vmem_to_hbm [thread:$0]  %s767_s29, 64, %s769_s8, [#allocation4]  }
 0x32e   :  { %993 = dma.done.wait [#allocation4], 64  }
 0x32f   :  { %994 = vsyncadd [#allocation4], 4294967232 }
 0x330   :  { %776 = vsyncpa [#allocation3], 1 }
 0x331   :  { %777 = vsyncpa [#allocation6], 1 }
 0x332   :  { %778 = vsyncpa [#allocation9], 1 }
 0x333   :  { %779 = vsyncpa [#allocation12], 1 }
 0x334   :  { %780 = vsyncpa [#allocation4], 1 }

</bundles_post_ra>
